<compile_context>
chip_gen: v7x
topology: tpu7x:2x2x1
jax: 0.10.0
libtpu: 0.0.40
codegen_flags: <defaults>
</compile_context>

<pallas_src>
import functools
import math

import jax
import jax.numpy as jnp
from jax.experimental import pallas as pl
from jax.experimental.pallas import tpu as pltpu


def _attention_kernel(q_ref, k_ref, v_ref, energy_ref, lin_ref, *, scale):
    # q_ref:      (BB, Q)
    # k_ref:      (BB, T, K)
    # v_ref:      (BB, T, V)
    # energy_ref: (BB, T, T)
    # lin_ref:    (BB, T, V)
    bb, t, _ = k_ref.shape
    v_dim = v_ref.shape[-1]

    q = q_ref[...][:, None, :]          # (BB, 1, Q) -- single query row per batch
    k = k_ref[...]                      # (BB, T, K)
    v = v_ref[...]                      # (BB, T, V)

    # scale * <q[b], k[b, j]> computed once per batch element (not T times).
    s = jnp.einsum("bxq,btq->bxt", q, k,
                   preferred_element_type=jnp.float32) * scale        # (BB, 1, T)

    # Numerically stable softmax over the key axis; divide goes to the EUP.
    s = s - jnp.max(s, axis=-1, keepdims=True)
    e = jnp.exp(s)
    denom = jnp.sum(e, axis=-1, keepdims=True)                        # (BB, 1, 1)
    p = e * pl.reciprocal(denom, approx=True)                         # (BB, 1, T)

    # Weighted sum of values, once per batch element.
    lin = jnp.einsum("bxt,btv->bxv", p.astype(v.dtype), v,
                     preferred_element_type=jnp.float32)              # (BB, 1, V)

    # The torch outputs repeat this row T times; broadcast only at the store.
    energy_ref[...] = jnp.broadcast_to(p, (bb, t, t)).astype(energy_ref.dtype)
    lin_ref[...] = jnp.broadcast_to(lin, (bb, t, v_dim)).astype(lin_ref.dtype)


def _pick_block_b(batch, cap=8):
    """Largest divisor of `batch` that is <= cap.

    Amortizes per-grid-step overhead across several batch elements while, for
    batch >= 2*cap, still leaving >=2 grid steps so v7x's two TensorCores can
    both get work ("parallel" batch axis).
    """
    bb = min(batch, cap)
    while batch % bb:
        bb -= 1
    return bb


def attention(query, keys, values, *, block_b=None):
    """query: [B, Q], keys: [B, T, K] (K == Q), values: [B, T, V]."""
    B, Q = query.shape
    Bk, T, K = keys.shape
    Bv, Tv, V = values.shape
    assert Bk == B and Bv == B and Tv == T
    assert K == Q, "dot-product attention assumes query_dim == key_dim"
    scale = 1.0 / math.sqrt(Q)

    bb = block_b if block_b is not None else _pick_block_b(B)
    assert B % bb == 0
    grid = (B // bb,)

    kernel = functools.partial(_attention_kernel, scale=scale)

    energy, lin = pl.pallas_call(
        kernel,
        out_shape=(
            jax.ShapeDtypeStruct((B, T, T), jnp.float32),
            jax.ShapeDtypeStruct((B, T, V), jnp.float32),
        ),
        grid_spec=pltpu.PrefetchScalarGridSpec(
            num_scalar_prefetch=0,
            grid=grid,
            in_specs=[
                pl.BlockSpec((bb, Q), lambda b: (b, 0)),
                pl.BlockSpec((bb, T, K), lambda b: (b, 0, 0)),
                pl.BlockSpec((bb, T, V), lambda b: (b, 0, 0)),
            ],
            out_specs=[
                pl.BlockSpec((bb, T, T), lambda b: (b, 0, 0)),
                pl.BlockSpec((bb, T, V), lambda b: (b, 0, 0)),
            ],
        ),
        compiler_params=pltpu.CompilerParams(
            dimension_semantics=("parallel",)),
    )(query, keys, values)

    # torch's .squeeze(1) on [B, T, V] only collapses when T == 1
    if T == 1:
        lin = lin[:, 0, :]
    return energy, lin


if __name__ == "__main__":
    B, T, Q, V = 2, 8, 32, 32
    key = jax.random.PRNGKey(0)
    kq, kk, kv = jax.random.split(key, 3)
    query = jax.random.normal(kq, (B, Q), dtype=jnp.float32)
    keys = jax.random.normal(kk, (B, T, Q), dtype=jnp.float32)
    values = jax.random.normal(kv, (B, T, V), dtype=jnp.float32)

    energy, lin = attention(query, keys, values)
    jax.block_until_ready((energy, lin))

    # pure-JAX reference check
    scale = 1.0 / math.sqrt(Q)
    row = jax.nn.softmax(jnp.einsum("bq,btq->bt", query, keys) * scale, axis=-1)
    energy_ref = jnp.broadcast_to(row[:, None, :], (B, T, T))
    lin_ref = jnp.einsum("bst,btv->bsv", energy_ref, values)
    assert energy.shape == (B, T, T) and lin.shape == (B, T, V)
    # tolerance loosened slightly for the approximate (EUP) reciprocal in softmax
    assert jnp.allclose(energy, energy_ref, atol=2e-3, rtol=2e-3)
    assert jnp.allclose(lin, lin_ref, atol=2e-3, rtol=2e-3)

    print("KERNEL_OK")
</pallas_src>

<mosaic_0001>
module attributes {stable_mosaic.version = 11 : i64} {
  func.func @_attention_kernel(%arg0: i32, %arg1: memref<2x32xf32, #tpu.memory_space<vmem>>, %arg2: memref<2x8x32xf32, #tpu.memory_space<vmem>>, %arg3: memref<2x8x32xf32, #tpu.memory_space<vmem>>, %arg4: memref<2x8x8xf32, #tpu.memory_space<vmem>>, %arg5: memref<2x8x32xf32, #tpu.memory_space<vmem>>) attributes {dimension_semantics = [#tpu.dimension_semantics<parallel>], iteration_bounds = array<i64: 1>, scalar_prefetch = 0 : i64, scratch_operands = 0 : i64, tpu.core_type = #tpu.core_type<tc>, window_params = [{transform_indices = @transform_0, window_bounds = array<i64: 2, 32>}, {transform_indices = @transform_1, window_bounds = array<i64: 2, 8, 32>}, {transform_indices = @transform_2, window_bounds = array<i64: 2, 8, 32>}, {transform_indices = @transform_3, window_bounds = array<i64: 2, 8, 8>}, {transform_indices = @transform_4, window_bounds = array<i64: 2, 8, 32>}]} {
    %c0 = arith.constant 0 : index
    %c0_0 = arith.constant 0 : index
    %0 = vector.load %arg1[%c0, %c0_0] : memref<2x32xf32, #tpu.memory_space<vmem>>, vector<2x32xf32>
    %1 = vector.shape_cast %0 : vector<2x32xf32> to vector<2x1x32xf32>
    %c0_1 = arith.constant 0 : index
    %c0_2 = arith.constant 0 : index
    %c0_3 = arith.constant 0 : index
    %2 = vector.load %arg2[%c0_1, %c0_2, %c0_3] : memref<2x8x32xf32, #tpu.memory_space<vmem>>, vector<2x8x32xf32>
    %c0_4 = arith.constant 0 : index
    %c0_5 = arith.constant 0 : index
    %c0_6 = arith.constant 0 : index
    %3 = vector.load %arg3[%c0_4, %c0_5, %c0_6] : memref<2x8x32xf32, #tpu.memory_space<vmem>>, vector<2x8x32xf32>
    "tpu.trace_start"() <{level = 10 : i32, message = "bxq,btq->bxt"}> : () -> ()
    %cst = arith.constant dense<0.000000e+00> : vector<2x1x8xf32>
    %4 = tpu.matmul %1, %2, %cst {dimension_numbers = #tpu.dot_dimension_numbers<[2], [2], [1], [1], [0, 0, 0, 1, 1, 1], [0], [0]>} : vector<2x1x32xf32>, vector<2x8x32xf32>, vector<2x1x8xf32> -> vector<2x1x8xf32>
    "tpu.trace_stop"() : () -> ()
    %cst_7 = arith.constant 0.176776692 : f32
    %5 = vector.broadcast %cst_7 : f32 to vector<2x1x8xf32>
    %6 = arith.mulf %4, %5 : vector<2x1x8xf32>
    %cst_8 = arith.constant dense<0xFF800000> : vector<2x1xf32>
    %7 = vector.multi_reduction <maximumf>, %6, %cst_8 [2] : vector<2x1x8xf32> to vector<2x1xf32>
    %8 = vector.shape_cast %7 : vector<2x1xf32> to vector<2x1x1xf32>
    %9 = vector.broadcast %8 : vector<2x1x1xf32> to vector<2x1x8xf32>
    %10 = arith.subf %6, %9 : vector<2x1x8xf32>
    %11 = math.exp %10 : vector<2x1x8xf32>
    %cst_9 = arith.constant dense<0.000000e+00> : vector<2x1xf32>
    %12 = vector.multi_reduction <add>, %11, %cst_9 [2] : vector<2x1x8xf32> to vector<2x1xf32>
    %13 = vector.shape_cast %12 : vector<2x1xf32> to vector<2x1x1xf32>
    %14 = tpu.reciprocal %13 {approx = true} : vector<2x1x1xf32> -> vector<2x1x1xf32>
    %15 = vector.broadcast %14 : vector<2x1x1xf32> to vector<2x1x8xf32>
    %16 = arith.mulf %11, %15 : vector<2x1x8xf32>
    "tpu.trace_start"() <{level = 10 : i32, message = "bxt,btv->bxv"}> : () -> ()
    %cst_10 = arith.constant dense<0.000000e+00> : vector<2x1x32xf32>
    %17 = tpu.matmul %16, %3, %cst_10 {dimension_numbers = #tpu.dot_dimension_numbers<[2], [1], [1], [2], [0, 0, 0, 1, 1, 2], [0], [0]>} : vector<2x1x8xf32>, vector<2x8x32xf32>, vector<2x1x32xf32> -> vector<2x1x32xf32>
    "tpu.trace_stop"() : () -> ()
    %18 = vector.shape_cast %16 : vector<2x1x8xf32> to vector<2x1x8xf32>
    %19 = vector.broadcast %18 : vector<2x1x8xf32> to vector<2x8x8xf32>
    %c0_11 = arith.constant 0 : index
    %c0_12 = arith.constant 0 : index
    %c0_13 = arith.constant 0 : index
    %20 = vector.load %arg4[%c0_11, %c0_12, %c0_13] : memref<2x8x8xf32, #tpu.memory_space<vmem>>, vector<2x8x8xf32>
    tpu.vector_store %arg4[%c0_11, %c0_12, %c0_13], %19 {strides = array<i32>} : memref<2x8x8xf32, #tpu.memory_space<vmem>>, vector<2x8x8xf32>,
    %21 = vector.shape_cast %17 : vector<2x1x32xf32> to vector<2x1x32xf32>
    %22 = vector.broadcast %21 : vector<2x1x32xf32> to vector<2x8x32xf32>
    %c0_14 = arith.constant 0 : index
    %c0_15 = arith.constant 0 : index
    %c0_16 = arith.constant 0 : index
    %23 = vector.load %arg5[%c0_14, %c0_15, %c0_16] : memref<2x8x32xf32, #tpu.memory_space<vmem>>, vector<2x8x32xf32>
    tpu.vector_store %arg5[%c0_14, %c0_15, %c0_16], %22 {strides = array<i32>} : memref<2x8x32xf32, #tpu.memory_space<vmem>>, vector<2x8x32xf32>,
    return
  }
  func.func @transform_0(%arg0: i32) -> (i32, i32) {
    %c0_i32 = arith.constant 0 : i32
    %c0_i32_0 = arith.constant 0 : i32
    return %arg0, %c0_i32 : i32, i32
  }
  func.func @transform_1(%arg0: i32) -> (i32, i32, i32) {
    %c0_i32 = arith.constant 0 : i32
    %c0_i32_0 = arith.constant 0 : i32
    %c0_i32_1 = arith.constant 0 : i32
    return %arg0, %c0_i32, %c0_i32_0 : i32, i32, i32
  }
  func.func @transform_2(%arg0: i32) -> (i32, i32, i32) {
    %c0_i32 = arith.constant 0 : i32
    %c0_i32_0 = arith.constant 0 : i32
    %c0_i32_1 = arith.constant 0 : i32
    return %arg0, %c0_i32, %c0_i32_0 : i32, i32, i32
  }
  func.func @transform_3(%arg0: i32) -> (i32, i32, i32) {
    %c0_i32 = arith.constant 0 : i32
    %c0_i32_0 = arith.constant 0 : i32
    %c0_i32_1 = arith.constant 0 : i32
    return %arg0, %c0_i32, %c0_i32_0 : i32, i32, i32
  }
  func.func @transform_4(%arg0: i32) -> (i32, i32, i32) {
    %c0_i32 = arith.constant 0 : i32
    %c0_i32_0 = arith.constant 0 : i32
    %c0_i32_1 = arith.constant 0 : i32
    return %arg0, %c0_i32, %c0_i32_0 : i32, i32, i32
  }
}

</mosaic_0001>

<bundles_post_ra>
// kernel: tpu_custom_call.1
= control target key start
LH: loop header
LB: loop body
LE: loop exit
PB: predicated region body
PF: predicated region fallthrough
CT: control target
= control target key end

     0   :  { %10 = vsyncpa [#allocation3], 0  ;;  %s754_s0 = inlined_call_operand.hbm [shape: f32[2,32], index: 0, kind: input, shape index: {}]   ;;  %s755_s1 = inlined_call_operand.hbm [shape: f32[2,8,32], index: 1, kind: input, shape index: {}]   ;;  %s756_s2 = inlined_call_operand.hbm [shape: f32[2,8,32], index: 2, kind: input, shape index: {}]   ;;  %s757_s3 = inlined_call_operand.hbm [shape: f32[2,8,8], index: 3, kind: output, shape index: {0}]   ;;  %s758_s4 = inlined_call_operand.hbm [shape: f32[2,8,32], index: 4, kind: output, shape index: {1}]  }
   0x1   :  { %11 = vsyncpa [#allocation6], 0 }
   0x2   :  { %12 = vsyncpa [#allocation4], 0 }
   0x3   :  { %13 = vsyncpa [#allocation10], 0  ;;  %s633_s15 = smov [#allocation5]   ;;  %s515_s19 = scalar_lea.hbm %s755_s1, 256 }
   0x4   :  { %s29_s16 = sshll.u32 %s633_s15, 4  ;;  %p516_p0 = scmp.ne.s32.totalorder %s755_s1, %s515_s19  ;;  %s30_s16 = int_to_ptr.vmem [resolvable:$true] %s29_s16 }
   0x5   :  { %p519_p1 = scmp.lt.u32.totalorder %s515_s19, %s755_s1 }
   0x7   :  { %p521_p2 = pnand %p519_p1, %p516_p0 }
   0x9   :  { %524 = shalt.err (!%p521_p2)
}
   0xa   :  { %s525_s24 = scalar_lea.vmem %s30_s16, 256  ;;  %p530_p4 = scmp.lt.s32.totalorder %s30_s16, %s30_s16 }
   0xb   :  { %p526_p3 = scmp.ne.s32.totalorder %s30_s16, %s525_s24  ;;  %p531_p5 = scmp.lt.s32.totalorder %s525_s24, %s525_s24 }
   0xd   :  { %p532_p6 = por %p531_p5, %p530_p4 }
   0xf   :  { %p533_p7 = pnand %p532_p6, %p526_p3 }
  0x11   :  { %536 = shalt.err (!%p533_p7)
}
  0x12   :  { %s634_s25 = smov 128   ;;  %s635_s26 = smov 8  }
  0x13   :  { %35 = dma.hbm_to_vmem [thread:$0]  %s755_s1, 256, %s30_s16, [#allocation6], %s634_s25, %s634_s25, %s635_s26  }
  0x14   :  { %s636_s29 = smov [#allocation2]   ;;  %s637_s5 = smov [#allocation7]  }
  0x15   :  { %s20_s30 = sshll.u32 %s636_s29, 4  ;;  %s41_s6 = sshll.u32 %s637_s5, 4  ;;  %s21_s30 = int_to_ptr.vmem [resolvable:$true] %s20_s30  ;;  %s42_s6 = int_to_ptr.vmem [resolvable:$true] %s41_s6 }
  0x16   :  { %s537_s9 = scalar_lea.hbm %s754_s0, 32 }
  0x17   :  { %p538_p8 = scmp.ne.s32.totalorder %s754_s0, %s537_s9  ;;  %p541_p9 = scmp.lt.u32.totalorder %s537_s9, %s754_s0 }
  0x19   :  { %p543_p10 = pnand %p541_p9, %p538_p8 }
  0x1b   :  { %546 = shalt.err (!%p543_p10)
}
  0x1c   :  { %s547_s1 = scalar_lea.vmem %s21_s30, 32  ;;  %p552_p12 = scmp.lt.s32.totalorder %s21_s30, %s21_s30 }
  0x1d   :  { %p548_p11 = scmp.ne.s32.totalorder %s21_s30, %s547_s1  ;;  %p553_p13 = scmp.lt.s32.totalorder %s547_s1, %s547_s1 }
  0x1f   :  { %p554_p0 = por %p553_p13, %p552_p12 }
  0x21   :  { %p555_p1 = pnand %p554_p0, %p548_p11 }
  0x23   :  { %558 = shalt.err (!%p555_p1)
}
  0x24   :  { %23 = dma.hbm_to_vmem [thread:$0]  %s754_s0, 32, %s21_s30, [#allocation3]  }
  0x25   :  { %s559_s18 = scalar_lea.hbm %s756_s2, 256 }
  0x26   :  { %p560_p2 = scmp.ne.s32.totalorder %s756_s2, %s559_s18  ;;  %p563_p3 = scmp.lt.u32.totalorder %s559_s18, %s756_s2 }
  0x28   :  { %p565_p4 = pnand %p563_p3, %p560_p2 }
  0x2a   :  { %568 = shalt.err (!%p565_p4)
}
  0x2b   :  { %s569_s23 = scalar_lea.vmem %s42_s6, 256  ;;  %p574_p6 = scmp.lt.s32.totalorder %s42_s6, %s42_s6 }
  0x2c   :  { %p570_p5 = scmp.ne.s32.totalorder %s42_s6, %s569_s23  ;;  %p575_p7 = scmp.lt.s32.totalorder %s569_s23, %s569_s23 }
  0x2e   :  { %p576_p8 = por %p575_p7, %p574_p6 }
  0x30   :  { %p577_p9 = pnand %p576_p8, %p570_p5 }
  0x32   :  { %580 = shalt.err (!%p577_p9)
}
  0x33   :  { %47 = dma.hbm_to_vmem [thread:$0]  %s756_s2, 256, %s42_s6, [#allocation6], %s634_s25, %s634_s25, %s635_s26  }
  0x34   :  { %625 = dma.done.wait [#allocation3], 32  }
  0x35   :  { %626 = vsyncadd [#allocation3], 4294967264 }
  0x36   :  { %627 = dma.done.wait [#allocation6], 512  }
  0x37   :  { %628 = vsyncadd [#allocation6], 4294966784  ;;  %v70_v0 = vlaneseq  ;;  %v638_v1 = vmov 0.0   ;;  %vm639_vm0 = vmmov 0   ;;  %v640_v2 = vmov 1966171168  }
  0x38   :  { %477 = vmatprep.subr.mxu0 %v638_v1  ;;  %479 = vmatprep.mubr.msk.f32.mxu0 %vm639_vm0, %v638_v1  ;;  %v68_v3 = vunpack.c.l.s4 %v640_v2  ;;  %vm85_vm1 = vcmask 261120   ;;  %v81_v7 = vld [vmem:[#allocation5] sm:$0xff]  ;;  %v462_v8 = vld.sshfl [vmem:[#allocation2] sm:$0x11 pattern:$0x75316420] }
  0x39   :  { %482 = vmatprep.subr.mxu1 %v638_v1  ;;  %v71_v4 = vshrl.u32 %v70_v0, 7  ;;  %484 = vmatprep.mubr.msk.f32.mxu1 %vm639_vm0, %v638_v1  ;;  %v82_v9 = vld [vmem:[#allocation5 + $0x8] sm:$0xff]  ;;  %v66_v11 = vcombine.high %v462_v8, %v462_v8  ;;  %vm238_vm2 = vcmask 57344   ;;  %v83_v31 = vld [vmem:[#allocation7] sm:$0xff]  ;;  %v84_v32 = vld [vmem:[#allocation7 + $0x8] sm:$0xff]  ;;  %vm261_vm3 = vcmask 64512  }
  0x3a   :  { %v69_v5 = vunpack.c.0.s8 %v68_v3  ;;  %478 = vmatpush3.xpose.msk.msra.mxu0 %vm85_vm1, %v81_v7  ;;  %483 = vmatpush3.xpose.msk.msra.mxu1 %vm85_vm1, %v82_v9  ;;  %s641_s2 = smov [#allocation8]  }
  0x3b   :  { %487 = vmatprep.subr.mxu0 %v638_v1  ;;  %492 = vmatprep.subr.mxu1 %v638_v1  ;;  %v410_v35 = vsub.s32 0, %v71_v4  ;;  %s433_s27 = sshll.u32 %s641_s2, 4  ;;  %s434_s27 = int_to_ptr.vmem [resolvable:$true] %s433_s27 }
  0x3c   :  { %v72_v6 = vsub.s32 %v69_v5, %v71_v4  ;;  %s581_s28 = scalar_lea.vmem %s434_s27, 256  ;;  %p586_p11 = scmp.lt.s32.totalorder %s434_s27, %s434_s27 }
  0x3d   :  { %p582_p10 = scmp.ne.s32.totalorder %s434_s27, %s581_s28  ;;  %p587_p12 = scmp.lt.s32.totalorder %s581_s28, %s581_s28 }
  0x3e   :  { %v73_v10 = vrot.slane %v462_v8, %v72_v6  ;;  %v80_v12 = vrot.slane %v66_v11, %v72_v6 }
  0x3f   :  { %p588_p13 = por %p587_p12, %p586_p11 }
  0x40   :  { %480 = vmatmul.mubr.msk.f32.vlgmr.msra.gmra.mrb[0].mxu0 %vm85_vm1, %v73_v10  ;;  %485 = vmatmul.mubr.msk.f32.vlgmr.msra.gmra.mrb[0].mxu1 %vm85_vm1, %v80_v12 }
  0x41   :  { %489 = vmatprep.mubr.msk.f32.mxu0 %vm639_vm0, %v638_v1  ;;  %494 = vmatprep.mubr.msk.f32.mxu1 %vm639_vm0, %v638_v1  ;;  %p589_p0 = pnand %p588_p13, %p582_p10 }
  0x42   :  { %488 = vmatpush3.msra.mxu0 %v83_v31  ;;  %493 = vmatpush3.msra.mxu1 %v84_v32 }
 0x113   :  { %v157_v13 = vpop.f32.mrb[0].mxu0  ;;  %v232_v16 = vpop.f32.mrb[0].mxu1 }
 0x114   :  { %v236_v14 = vmul.f32 0.17677669, %v157_v13  ;;  %v481_v15 = vpop.f32.mrb[1].mxu0  ;;  %v237_v17 = vmul.f32 0.17677669, %v232_v16  ;;  %v486_v18 = vpop.f32.mrb[1].mxu1 }
 0x116   :  { %v239_v19 = vsel %vm238_vm2, %v236_v14, -inf  ;;  %v242_v20 = vsel %vm238_vm2, %v237_v17, -inf }
 0x117   :  { %240 = vmax.xlane.f32.xlu0 %v239_v19 }
 0x11b   :  { %243 = vmax.xlane.f32.xlu0 %v242_v20 }
 0x1a4   :  { %v241_v21 = vpop.xlane.xlu0 %240 }
 0x1a5   :  { %v245_v22 = vsub.f32 %v236_v14, %v241_v21 }
 0x1a7   :  { %v247_v23 = vmul.f32 1.442695, %v245_v22 }
 0x1a8   :  { %v244_v24 = vpop.xlane.xlu0 %243 }
 0x1a9   :  { %507 = vpow2.f32 %v247_v23  ;;  %v246_v25 = vsub.f32 %v237_v17, %v244_v24 }
 0x1ab   :  { %v249_v26 = vmul.f32 1.442695, %v246_v25 }
 0x1ad   :  { %509 = vpow2.f32 %v249_v26 }
 0x1b3   :  { %v508_v27 = vpop.eup %507 }
 0x1b4   :  { %v251_v28 = vsel %vm238_vm2, %v508_v27, 0.0 }
 0x1b5   :  { %252 = vadd.xlane.f32.xlu1 %v251_v28 }
 0x1b7   :  { %v510_v29 = vpop.eup %509 }
 0x1b8   :  { %v254_v30 = vsel %vm238_vm2, %v510_v29, 0.0 }
 0x1b9   :  { %255 = vadd.xlane.f32.xlu1 %v254_v30 }
 0x242   :  { %v253_v33 = vpop.xlane.xlu1 %252 }
 0x243   :  { %511 = vrcp.f32 %v253_v33 }
 0x246   :  { %v256_v34 = vpop.xlane.xlu1 %255 }
 0x247   :  { %513 = vrcp.f32 %v256_v34 }
 0x24d   :  { %v512_v36 = vpop.eup %511 }
 0x24e   :  { %v259_v37 = vmul.f32 %v512_v36, %v508_v27 }
 0x250   :  { %490 = vmatmul.mubr.msk.f32.vlgmr.msra.gmra.mrb[2].mxu0 %vm261_vm3, %v259_v37  ;;  %v411_v38 = vrot.slane %v259_v37, %v410_v35 }
 0x251   :  { %v514_v39 = vpop.eup %513 }
 0x252   :  { %v260_v40 = vmul.f32 %v514_v39, %v510_v29  ;;  %416 = vst.msk [vmem:[#allocation8] sm:$0xff] %vm261_vm3, %v411_v38 }
 0x254   :  { %495 = vmatmul.mubr.msk.f32.vlgmr.msra.gmra.mrb[2].mxu1 %vm261_vm3, %v260_v40  ;;  %v415_v41 = vrot.slane %v260_v40, %v410_v35 }
 0x256   :  { %417 = vst.msk [vmem:[#allocation8 + $0x8] sm:$0xff] %vm261_vm3, %v415_v41 }
 0x257   :  { %592 = shalt.err (!%p589_p0)
}
 0x258   :  { %s593_s5 = scalar_lea.hbm %s757_s3, 256 }
 0x259   :  { %p594_p1 = scmp.ne.s32.totalorder %s757_s3, %s593_s5  ;;  %p597_p2 = scmp.lt.u32.totalorder %s593_s5, %s757_s3 }
 0x25b   :  { %p599_p3 = pnand %p597_p2, %p594_p1 }
 0x25d   :  { %602 = shalt.err (!%p599_p3)
}
 0x25e   :  { %439 = dma.vmem_to_hbm [thread:$0]  %s434_s27, 256, %s757_s3, [#allocation4], %s634_s25, %s634_s25, %s635_s26  }
 0x25f   :  { %s642_s12 = smov [#allocation9]  }
 0x260   :  { %s445_s13 = sshll.u32 %s642_s12, 4  ;;  %s446_s13 = int_to_ptr.vmem [resolvable:$true] %s445_s13 }
 0x261   :  { %s603_s1 = scalar_lea.vmem %s446_s13, 256  ;;  %p608_p5 = scmp.lt.s32.totalorder %s446_s13, %s446_s13 }
 0x262   :  { %p604_p4 = scmp.ne.s32.totalorder %s446_s13, %s603_s1  ;;  %p609_p6 = scmp.lt.s32.totalorder %s603_s1, %s603_s1 }
 0x264   :  { %p610_p7 = por %p609_p6, %p608_p5 }
 0x266   :  { %p611_p8 = pnand %p610_p7, %p604_p4 }
 0x323   :  { %v331_v42 = vpop.f32.mrb[2].mxu0 }
 0x324   :  { %v421_v43 = vrot.slane %v331_v42, %v410_v35  ;;  %v491_v44 = vpop.f32.mrb[3].mxu0 }
 0x326   :  { %426 = vst.msk [vmem:[#allocation9] sm:$0xff] %vm85_vm1, %v421_v43 }
 0x327   :  { %v404_v45 = vpop.f32.mrb[2].mxu1 }
 0x328   :  { %v425_v46 = vrot.slane %v404_v45, %v410_v35  ;;  %v496_v47 = vpop.f32.mrb[3].mxu1 }
 0x32a   :  { %427 = vst.msk [vmem:[#allocation9 + $0x8] sm:$0xff] %vm85_vm1, %v425_v46 }
 0x32b   :  { %614 = shalt.err (!%p611_p8)
}
 0x32c   :  { %s615_s15 = scalar_lea.hbm %s758_s4, 256 }
 0x32d   :  { %p616_p9 = scmp.ne.s32.totalorder %s758_s4, %s615_s15  ;;  %p619_p10 = scmp.lt.u32.totalorder %s615_s15, %s758_s4 }
 0x32f   :  { %p621_p11 = pnand %p619_p10, %p616_p9 }
 0x331   :  { %624 = shalt.err (!%p621_p11)
}
 0x332   :  { %451 = dma.vmem_to_hbm [thread:$0]  %s446_s13, 256, %s758_s4, [#allocation10], %s634_s25, %s634_s25, %s635_s26  }
 0x333   :  { %629 = dma.done.wait [#allocation4], 256  }
 0x334   :  { %630 = vsyncadd [#allocation4], 4294967040 }
 0x335   :  { %631 = dma.done.wait [#allocation10], 256  }
 0x336   :  { %632 = vsyncadd [#allocation10], 4294967040 }
 0x337   :  { %458 = vsyncpa [#allocation3], 1 }
 0x338   :  { %459 = vsyncpa [#allocation6], 1 }
 0x339   :  { %460 = vsyncpa [#allocation4], 1 }
 0x33a   :  { %461 = vsyncpa [#allocation10], 1 }

</bundles_post_ra>
